<compile_context>
chip_gen: v5e
topology: v5e:2x2
jax: 0.10.0
libtpu: 0.0.40
codegen_flags: <defaults>
</compile_context>

<pallas_src>
from functools import partial

import jax
import jax.numpy as jnp
from jax.experimental import pallas as pl
from jax.experimental.pallas import tpu as pltpu


def _fast_self_attn_kernel(x_ref, w1_ref, b1_ref, wka_ref, bka_ref,
                           wt_ref, bt_ref, o_ref, *, nb, seq, hidden):
    H = hidden
    rows = nb * seq
    # x block: [nb, S, H] -> [nb*S, H] (S == 8 keeps the merge tile-aligned).
    x2 = x_ref[...].reshape(rows, H)

    # Fused projection: one MXU pass yields [q | k | q-logits].  The per-head
    # broadcast of query_att and the 1/sqrt(dh) scale are folded into W1/b1.
    y = jnp.dot(x2, w1_ref[...], preferred_element_type=jnp.float32) + b1_ref[...]
    q2 = y[:, :H]                                                  # mixed_query
    k2 = y[:, H:2 * H]                                             # mixed_key

    q3 = q2.reshape(nb, seq, H)
    k3 = k2.reshape(nb, seq, H)
    qs3 = y[:, 2 * H:].reshape(nb, seq, H)                         # query logits

    # Softmax over the sequence axis (per column == per head after expansion).
    # TODO(synk): optional attention_mask add (mask=None path implemented).
    qs3 = qs3 - jnp.max(qs3, axis=1, keepdims=True)
    qe = jnp.exp(qs3)
    qw = qe * pl.reciprocal(jnp.sum(qe, axis=1, keepdims=True), approx=False)

    # pooled_query[b, c] = sum_s qw[b, s, c] * q[b, s, c]
    pooled_q = jnp.sum(qw * q3, axis=1, keepdims=True)             # [nb, 1, H]

    # mixed_query_key_layer = key * pooled_query (broadcast over seq)
    mixed_qk3 = k3 * pooled_q                                      # [nb, S, H]
    mixed_qk2 = mixed_qk3.reshape(rows, H)

    # key attention logits (head-expanded, scale pre-folded), softmax over seq.
    ks3 = (jnp.dot(mixed_qk2, wka_ref[...], preferred_element_type=jnp.float32)
           + bka_ref[...]).reshape(nb, seq, H)
    ks3 = ks3 - jnp.max(ks3, axis=1, keepdims=True)
    ke = jnp.exp(ks3)
    kw = ke * pl.reciprocal(jnp.sum(ke, axis=1, keepdims=True), approx=False)

    pooled_k = jnp.sum(kw * mixed_qk3, axis=1, keepdims=True)      # [nb, 1, H]

    # weighted_value = pooled_key * query_layer, then transform + residual q.
    wv2 = (q3 * pooled_k).reshape(rows, H)
    out2 = (jnp.dot(wv2, wt_ref[...], preferred_element_type=jnp.float32)
            + bt_ref[...] + q2)
    o_ref[...] = out2.reshape(nb, seq, H)


def _grid_block(B, S, target_rows=1024):
    """Pick (nb, steps): nb*S ~ target_rows rows per grid step, while keeping
    the grid >= 2 (and even) when B > 1 so v7x's two TensorCores stay busy.
    B is later zero-padded to steps*nb so prime/odd batch sizes don't fall
    back to tiny steps."""
    max_nb = max(1, target_rows // max(S, 1))
    steps = -(-B // max_nb)                 # ceil
    if B > 1:
        steps = max(steps, 2)
        steps += steps % 2                  # even -> balanced across 2 TCs
    nb = -(-B // steps)
    return nb, steps


@partial(jax.jit, static_argnames=("num_heads",))
def fast_self_attention_pallas(x, wq_t, bq, wk_t, bk, wqa_t, bqa, wka_t, bka,
                               wt_t, bt, *, num_heads):
    B, S, H = x.shape
    dh = H // num_heads
    scale = 1.0 / float(dh) ** 0.5

    # Fold per-head broadcast AND 1/sqrt(dh) into the attention projections:
    # repeating the [H, nH] columns dh times gives [H, H] weights whose output
    # column c carries head(c)'s (pre-scaled) logit.
    wqa_x = jnp.repeat(wqa_t * scale, dh, axis=1)      # [H, H]
    bqa_x = jnp.repeat(bqa * scale, dh, axis=1)        # [1, H]
    wka_x = jnp.repeat(wka_t * scale, dh, axis=1)      # [H, H]
    bka_x = jnp.repeat(bka * scale, dh, axis=1)        # [1, H]

    # Fuse x->{q, k, q-logits} into a single matmul: qs = x @ (wq @ wqa_x) + ...
    w1 = jnp.concatenate([wq_t, wk_t, wq_t @ wqa_x], axis=1)        # [H, 3H]
    b1 = jnp.concatenate([bq, bk, bq @ wqa_x + bqa_x], axis=1)      # [1, 3H]

    # Batch blocking + padding for awkward batch sizes.
    nb, steps = _grid_block(B, S)
    b_pad = nb * steps
    x_p = x if b_pad == B else jnp.pad(x, ((0, b_pad - B), (0, 0), (0, 0)))

    full = lambda a: pl.BlockSpec(a.shape, lambda b: (0,) * a.ndim)
    kernel = partial(_fast_self_attn_kernel, nb=nb, seq=S, hidden=H)
    out = pl.pallas_call(
        kernel,
        out_shape=jax.ShapeDtypeStruct((b_pad, S, H), jnp.float32),
        grid=(steps,),
        in_specs=[
            pl.BlockSpec((nb, S, H), lambda b: (b, 0, 0)),   # hidden_states
            full(w1), full(b1),
            full(wka_x), full(bka_x),
            full(wt_t), full(bt),
        ],
        out_specs=pl.BlockSpec((nb, S, H), lambda b: (b, 0, 0)),
        compiler_params=pltpu.CompilerParams(dimension_semantics=("parallel",)),
    )(x_p, w1, b1, wka_x, bka_x, wt_t, bt)
    return out if b_pad == B else out[:B]


def fast_self_attention_ref(x, wq_t, bq, wk_t, bk, wqa_t, bqa, wka_t, bka,
                            wt_t, bt, num_heads):
    """Pure-JAX reference mirroring the PyTorch forward verbatim."""
    B, S, H = x.shape
    dh = H // num_heads
    q = x @ wq_t + bq                                             # [B,S,H]
    k = x @ wk_t + bk
    qfs = jnp.transpose(q @ wqa_t + bqa, (0, 2, 1)) / dh ** 0.5   # [B,nH,S]
    qw = jax.nn.softmax(qfs, axis=-1)[:, :, None, :]              # [B,nH,1,S]
    ql = q.reshape(B, S, num_heads, dh).transpose(0, 2, 1, 3)     # [B,nH,S,dh]
    pooled_q = jnp.matmul(qw, ql)                                 # [B,nH,1,dh]
    pooled_q = pooled_q.transpose(0, 2, 1, 3).reshape(B, 1, H)
    mixed_qk = k * pooled_q
    qks = jnp.transpose(mixed_qk @ wka_t + bka, (0, 2, 1)) / dh ** 0.5
    qkw = jax.nn.softmax(qks, axis=-1)[:, :, None, :]
    kl = mixed_qk.reshape(B, S, num_heads, dh).transpose(0, 2, 1, 3)
    pooled_k = jnp.matmul(qkw, kl)                                # [B,nH,1,dh]
    wv = (pooled_k * ql).transpose(0, 2, 1, 3).reshape(B, S, H)
    return wv @ wt_t + bt + q


if __name__ == "__main__":
    # Small shapes consistent with the module: hidden=32, heads=8 -> head_size=4.
    B, S, H, NH = 2, 8, 32, 8
    STD = 0.02

    key = jax.random.PRNGKey(0)
    ks = jax.random.split(key, 6)
    x = jax.random.normal(ks[0], (B, S, H), jnp.float32)

    # nn.Linear weights ~ N(0, 0.02), biases zero (module's init_weights),
    # stored pre-transposed as [in, out].
    wq_t = STD * jax.random.normal(ks[1], (H, H), jnp.float32)
    wk_t = STD * jax.random.normal(ks[2], (H, H), jnp.float32)
    wqa_t = STD * jax.random.normal(ks[3], (H, NH), jnp.float32)
    wka_t = STD * jax.random.normal(ks[4], (H, NH), jnp.float32)
    wt_t = STD * jax.random.normal(ks[5], (H, H), jnp.float32)
    bq = jnp.zeros((1, H), jnp.float32)
    bk = jnp.zeros((1, H), jnp.float32)
    bqa = jnp.zeros((1, NH), jnp.float32)
    bka = jnp.zeros((1, NH), jnp.float32)
    bt = jnp.zeros((1, H), jnp.float32)

    out = fast_self_attention_pallas(x, wq_t, bq, wk_t, bk, wqa_t, bqa,
                                     wka_t, bka, wt_t, bt, num_heads=NH)
    out = jax.block_until_ready(out)

    ref = fast_self_attention_ref(x, wq_t, bq, wk_t, bk, wqa_t, bqa,
                                  wka_t, bka, wt_t, bt, NH)
    assert out.shape == (B, S, H)
    assert jnp.allclose(out, ref, atol=1e-5, rtol=1e-5), "mismatch vs reference"
    print("KERNEL_OK")
</pallas_src>

<mosaic_0001>
module attributes {stable_mosaic.version = 11 : i64} {
  func.func @_fast_self_attn_kernel(%arg0: i32, %arg1: memref<1x8x32xf32, #tpu.memory_space<vmem>>, %arg2: memref<32x96xf32, #tpu.memory_space<vmem>>, %arg3: memref<1x96xf32, #tpu.memory_space<vmem>>, %arg4: memref<32x32xf32, #tpu.memory_space<vmem>>, %arg5: memref<1x32xf32, #tpu.memory_space<vmem>>, %arg6: memref<32x32xf32, #tpu.memory_space<vmem>>, %arg7: memref<1x32xf32, #tpu.memory_space<vmem>>, %arg8: memref<1x8x32xf32, #tpu.memory_space<vmem>>) attributes {dimension_semantics = [#tpu.dimension_semantics<parallel>], iteration_bounds = array<i64: 2>, scalar_prefetch = 0 : i64, scratch_operands = 0 : i64, tpu.core_type = #tpu.core_type<tc>, window_params = [{transform_indices = @transform_0, window_bounds = array<i64: 1, 8, 32>}, {pipeline_mode = #tpu.pipeline_mode<synchronous>, transform_indices = @transform_1, window_bounds = array<i64: 32, 96>}, {pipeline_mode = #tpu.pipeline_mode<synchronous>, transform_indices = @transform_2, window_bounds = array<i64: 1, 96>}, {pipeline_mode = #tpu.pipeline_mode<synchronous>, transform_indices = @transform_3, window_bounds = array<i64: 32, 32>}, {pipeline_mode = #tpu.pipeline_mode<synchronous>, transform_indices = @transform_4, window_bounds = array<i64: 1, 32>}, {pipeline_mode = #tpu.pipeline_mode<synchronous>, transform_indices = @transform_5, window_bounds = array<i64: 32, 32>}, {pipeline_mode = #tpu.pipeline_mode<synchronous>, transform_indices = @transform_6, window_bounds = array<i64: 1, 32>}, {transform_indices = @transform_7, window_bounds = array<i64: 1, 8, 32>}]} {
    %c0 = arith.constant 0 : index
    %c0_0 = arith.constant 0 : index
    %c0_1 = arith.constant 0 : index
    %0 = vector.load %arg1[%c0, %c0_0, %c0_1] : memref<1x8x32xf32, #tpu.memory_space<vmem>>, vector<1x8x32xf32>
    %1 = vector.shape_cast %0 : vector<1x8x32xf32> to vector<8x32xf32>
    %c0_2 = arith.constant 0 : index
    %c0_3 = arith.constant 0 : index
    %2 = vector.load %arg2[%c0_2, %c0_3] : memref<32x96xf32, #tpu.memory_space<vmem>>, vector<32x96xf32>
    %cst = arith.constant dense<0.000000e+00> : vector<8x96xf32>
    %3 = tpu.matmul %1, %2, %cst {dimension_numbers = #tpu.dot_dimension_numbers<[1], [0], [0], [1], [0, 0, 1, 1], [], []>} : vector<8x32xf32>, vector<32x96xf32>, vector<8x96xf32> -> vector<8x96xf32>
    %c0_4 = arith.constant 0 : index
    %c0_5 = arith.constant 0 : index
    %4 = vector.load %arg3[%c0_4, %c0_5] : memref<1x96xf32, #tpu.memory_space<vmem>>, vector<1x96xf32>
    %5 = vector.broadcast %4 : vector<1x96xf32> to vector<8x96xf32>
    %6 = arith.addf %3, %5 : vector<8x96xf32>
    %7 = vector.extract_strided_slice %6 {offsets = [0, 0], sizes = [8, 32], strides = [1, 1]} : vector<8x96xf32> to vector<8x32xf32>
    %8 = vector.extract_strided_slice %6 {offsets = [0, 32], sizes = [8, 32], strides = [1, 1]} : vector<8x96xf32> to vector<8x32xf32>
    %9 = vector.shape_cast %7 : vector<8x32xf32> to vector<1x8x32xf32>
    %10 = vector.shape_cast %8 : vector<8x32xf32> to vector<1x8x32xf32>
    %11 = vector.extract_strided_slice %6 {offsets = [0, 64], sizes = [8, 32], strides = [1, 1]} : vector<8x96xf32> to vector<8x32xf32>
    %12 = vector.shape_cast %11 : vector<8x32xf32> to vector<1x8x32xf32>
    %cst_6 = arith.constant dense<0xFF800000> : vector<1x32xf32>
    %13 = vector.multi_reduction <maximumf>, %12, %cst_6 [1] : vector<1x8x32xf32> to vector<1x32xf32>
    %14 = vector.shape_cast %13 : vector<1x32xf32> to vector<1x1x32xf32>
    %15 = vector.broadcast %14 : vector<1x1x32xf32> to vector<1x8x32xf32>
    %16 = arith.subf %12, %15 : vector<1x8x32xf32>
    %17 = math.exp %16 : vector<1x8x32xf32>
    %cst_7 = arith.constant dense<0.000000e+00> : vector<1x32xf32>
    %18 = vector.multi_reduction <add>, %17, %cst_7 [1] : vector<1x8x32xf32> to vector<1x32xf32>
    %19 = vector.shape_cast %18 : vector<1x32xf32> to vector<1x1x32xf32>
    %20 = tpu.reciprocal %19 : vector<1x1x32xf32> -> vector<1x1x32xf32>
    %21 = vector.broadcast %20 : vector<1x1x32xf32> to vector<1x8x32xf32>
    %22 = arith.mulf %17, %21 : vector<1x8x32xf32>
    %23 = arith.mulf %22, %9 : vector<1x8x32xf32>
    %cst_8 = arith.constant dense<0.000000e+00> : vector<1x32xf32>
    %24 = vector.multi_reduction <add>, %23, %cst_8 [1] : vector<1x8x32xf32> to vector<1x32xf32>
    %25 = vector.shape_cast %24 : vector<1x32xf32> to vector<1x1x32xf32>
    %26 = vector.broadcast %25 : vector<1x1x32xf32> to vector<1x8x32xf32>
    %27 = arith.mulf %10, %26 : vector<1x8x32xf32>
    %28 = vector.shape_cast %27 : vector<1x8x32xf32> to vector<8x32xf32>
    %c0_9 = arith.constant 0 : index
    %c0_10 = arith.constant 0 : index
    %29 = vector.load %arg4[%c0_9, %c0_10] : memref<32x32xf32, #tpu.memory_space<vmem>>, vector<32x32xf32>
    %cst_11 = arith.constant dense<0.000000e+00> : vector<8x32xf32>
    %30 = tpu.matmul %28, %29, %cst_11 {dimension_numbers = #tpu.dot_dimension_numbers<[1], [0], [0], [1], [0, 0, 1, 1], [], []>} : vector<8x32xf32>, vector<32x32xf32>, vector<8x32xf32> -> vector<8x32xf32>
    %c0_12 = arith.constant 0 : index
    %c0_13 = arith.constant 0 : index
    %31 = vector.load %arg5[%c0_12, %c0_13] : memref<1x32xf32, #tpu.memory_space<vmem>>, vector<1x32xf32>
    %32 = vector.broadcast %31 : vector<1x32xf32> to vector<8x32xf32>
    %33 = arith.addf %30, %32 : vector<8x32xf32>
    %34 = vector.shape_cast %33 : vector<8x32xf32> to vector<1x8x32xf32>
    %cst_14 = arith.constant dense<0xFF800000> : vector<1x32xf32>
    %35 = vector.multi_reduction <maximumf>, %34, %cst_14 [1] : vector<1x8x32xf32> to vector<1x32xf32>
    %36 = vector.shape_cast %35 : vector<1x32xf32> to vector<1x1x32xf32>
    %37 = vector.broadcast %36 : vector<1x1x32xf32> to vector<1x8x32xf32>
    %38 = arith.subf %34, %37 : vector<1x8x32xf32>
    %39 = math.exp %38 : vector<1x8x32xf32>
    %cst_15 = arith.constant dense<0.000000e+00> : vector<1x32xf32>
    %40 = vector.multi_reduction <add>, %39, %cst_15 [1] : vector<1x8x32xf32> to vector<1x32xf32>
    %41 = vector.shape_cast %40 : vector<1x32xf32> to vector<1x1x32xf32>
    %42 = tpu.reciprocal %41 : vector<1x1x32xf32> -> vector<1x1x32xf32>
    %43 = vector.broadcast %42 : vector<1x1x32xf32> to vector<1x8x32xf32>
    %44 = arith.mulf %39, %43 : vector<1x8x32xf32>
    %45 = arith.mulf %44, %27 : vector<1x8x32xf32>
    %cst_16 = arith.constant dense<0.000000e+00> : vector<1x32xf32>
    %46 = vector.multi_reduction <add>, %45, %cst_16 [1] : vector<1x8x32xf32> to vector<1x32xf32>
    %47 = vector.shape_cast %46 : vector<1x32xf32> to vector<1x1x32xf32>
    %48 = vector.broadcast %47 : vector<1x1x32xf32> to vector<1x8x32xf32>
    %49 = arith.mulf %9, %48 : vector<1x8x32xf32>
    %50 = vector.shape_cast %49 : vector<1x8x32xf32> to vector<8x32xf32>
    %c0_17 = arith.constant 0 : index
    %c0_18 = arith.constant 0 : index
    %51 = vector.load %arg6[%c0_17, %c0_18] : memref<32x32xf32, #tpu.memory_space<vmem>>, vector<32x32xf32>
    %cst_19 = arith.constant dense<0.000000e+00> : vector<8x32xf32>
    %52 = tpu.matmul %50, %51, %cst_19 {dimension_numbers = #tpu.dot_dimension_numbers<[1], [0], [0], [1], [0, 0, 1, 1], [], []>} : vector<8x32xf32>, vector<32x32xf32>, vector<8x32xf32> -> vector<8x32xf32>
    %c0_20 = arith.constant 0 : index
    %c0_21 = arith.constant 0 : index
    %53 = vector.load %arg7[%c0_20, %c0_21] : memref<1x32xf32, #tpu.memory_space<vmem>>, vector<1x32xf32>
    %54 = vector.broadcast %53 : vector<1x32xf32> to vector<8x32xf32>
    %55 = arith.addf %52, %54 : vector<8x32xf32>
    %56 = arith.addf %55, %7 : vector<8x32xf32>
    %57 = vector.shape_cast %56 : vector<8x32xf32> to vector<1x8x32xf32>
    %c0_22 = arith.constant 0 : index
    %c0_23 = arith.constant 0 : index
    %c0_24 = arith.constant 0 : index
    %58 = vector.load %arg8[%c0_22, %c0_23, %c0_24] : memref<1x8x32xf32, #tpu.memory_space<vmem>>, vector<1x8x32xf32>
    tpu.vector_store %arg8[%c0_22, %c0_23, %c0_24], %57 {strides = array<i32>} : memref<1x8x32xf32, #tpu.memory_space<vmem>>, vector<1x8x32xf32>,
    return
  }
  func.func @transform_0(%arg0: i32) -> (i32, i32, i32) {
    %c0_i32 = arith.constant 0 : i32
    %c0_i32_0 = arith.constant 0 : i32
    %c0_i32_1 = arith.constant 0 : i32
    return %arg0, %c0_i32, %c0_i32_0 : i32, i32, i32
  }
  func.func @transform_1(%arg0: i32) -> (i32, i32) {
    %c0_i32 = arith.constant 0 : i32
    %c0_i32_0 = arith.constant 0 : i32
    %c0_i32_1 = arith.constant 0 : i32
    return %c0_i32, %c0_i32_0 : i32, i32
  }
  func.func @transform_2(%arg0: i32) -> (i32, i32) {
    %c0_i32 = arith.constant 0 : i32
    %c0_i32_0 = arith.constant 0 : i32
    %c0_i32_1 = arith.constant 0 : i32
    return %c0_i32, %c0_i32_0 : i32, i32
  }
  func.func @transform_3(%arg0: i32) -> (i32, i32) {
    %c0_i32 = arith.constant 0 : i32
    %c0_i32_0 = arith.constant 0 : i32
    %c0_i32_1 = arith.constant 0 : i32
    return %c0_i32, %c0_i32_0 : i32, i32
  }
  func.func @transform_4(%arg0: i32) -> (i32, i32) {
    %c0_i32 = arith.constant 0 : i32
    %c0_i32_0 = arith.constant 0 : i32
    %c0_i32_1 = arith.constant 0 : i32
    return %c0_i32, %c0_i32_0 : i32, i32
  }
  func.func @transform_5(%arg0: i32) -> (i32, i32) {
    %c0_i32 = arith.constant 0 : i32
    %c0_i32_0 = arith.constant 0 : i32
    %c0_i32_1 = arith.constant 0 : i32
    return %c0_i32, %c0_i32_0 : i32, i32
  }
  func.func @transform_6(%arg0: i32) -> (i32, i32) {
    %c0_i32 = arith.constant 0 : i32
    %c0_i32_0 = arith.constant 0 : i32
    %c0_i32_1 = arith.constant 0 : i32
    return %c0_i32, %c0_i32_0 : i32, i32
  }
  func.func @transform_7(%arg0: i32) -> (i32, i32, i32) {
    %c0_i32 = arith.constant 0 : i32
    %c0_i32_0 = arith.constant 0 : i32
    %c0_i32_1 = arith.constant 0 : i32
    return %arg0, %c0_i32, %c0_i32_0 : i32, i32, i32
  }
}

</mosaic_0001>

<bundles_post_ra>
// kernel: fast_self_attention_pallas.1
= control target key start
LH: loop header
LB: loop body
LE: loop exit
PB: predicated region body
PF: predicated region fallthrough
CT: control target
= control target key end

     0   :  { %12 = vsyncpa [#allocation3], 0  ;;  %s859_s0 = inlined_call_operand.vmem [shape: f32[2,8,32], index: 0, kind: input, shape index: {}]   ;;  %s860_s1 = inlined_call_operand.vmem [shape: f32[32,96], index: 1, kind: input, shape index: {}]   ;;  %s861_s2 = inlined_call_operand.vmem [shape: f32[1,96], index: 2, kind: input, shape index: {}]   ;;  %s862_s3 = inlined_call_operand.vmem [shape: f32[32,32], index: 3, kind: input, shape index: {}]   ;;  %s863_s4 = inlined_call_operand.vmem [shape: f32[1,32], index: 4, kind: input, shape index: {}]   ;;  %s864_s5 = inlined_call_operand.vmem [shape: f32[32,32], index: 5, kind: input, shape index: {}]   ;;  %s865_s6 = inlined_call_operand.vmem [shape: f32[1,32], index: 6, kind: input, shape index: {}]   ;;  %s866_s7 = inlined_call_operand.hbm [shape: f32[2,8,32], index: 7, kind: output, shape index: {}]  }
   0x1   :  { %14 = vsyncpa [#allocation3 + $0x1], 0  ;;  %s711_s24 = smov 0   ;;  %s713_s25 = smov 0  }
   0x2   :  { %s715_s26 = smov 0   ;;  %s717_s27 = smov 0  }
   0x3 LB: > { %s732_s28 = sadd.s32 4294967295, %s667_s27   ;;  %s540_s29 = sadd.s32 4294967294, %s667_s27   ;;  %s667_s27 = sphi %s717_s27, %s872_s27   ;;  %s663_s26 = sphi %s715_s26, %s871_s26   ;;  %s659_s25 = sphi %s713_s25, %s870_s25   ;;  %s655_s24 = sphi %s711_s24, %s869_s24  }
   0x4   : > { %s736_s30 = sadd.s32 1, %s667_s27   ;;  %s179_s8 = sadd.s32 1, %s663_s26 }
   0x5   : > { %s176_s9 = ssub.s32 %s667_s27, %s736_s30  ;;  %p189_p0 = scmp.ne.s32.totalorder %s663_s26, %s659_s25 }
   0x6   : > { %p177_p1 = scmp.eq.s32.totalorder %s176_s9, 0  ;;  %p190_p2 = scmp.eq.s32.totalorder %s732_s28, 1 }
   0x7   : > { %p195_p3 = scmp.ne.s32.totalorder %s659_s25, %s655_s24  ;;  %p196_p4 = scmp.eq.s32.totalorder %s540_s29, 1 }
   0x8   : > { %s747_s10 = scalar_select %p177_p1, %s663_s26, %s179_s8  }
   0x9   : > { %p749_p5 = por %p190_p2, %p189_p0  ;;  %p753_p6 = por %p196_p4, %p195_p3 }
   0xa   : > { %p543_p7 = scmp.ge.s32.totalorder %s667_s27, 1  ;;  %p239_p8 = scmp.lt.s32.totalorder %s667_s27, 3 }
   0xc   : > { %p240_p9 = pnand %p543_p7, %p239_p8 }
   0xd   : > { %p270_p10 = scmp.lt.s32.totalorder (!%p240_p9), %s732_s28, 1  ;;  %s669_s14 = smov (!%p240_p9), 64  }
   0xe   : > { %243 = sbr.rel (%p240_p9) target bundleno = 857 (0x359), region = 48  ;;  %s670_s15 = smov (!%p240_p9), 96  }
   0xf   : > { %s267_s20 = sand.u32 (!%p240_p9), 1, %s659_s25  }
  0x10   : > { %s544_s21 = sshll.u32 (!%p240_p9), %s267_s20, 3 }
  0x13   : > { %v278_v0 = vld [vmem:[%s860_s1 + $0x18] sm:$0xff]  ;;  %v277_v1 = vld [vmem:[%s860_s1 + $0x10] sm:$0xff]  ;;  %v276_v2 = vld [vmem:[%s860_s1 + $0x8] sm:$0xff]  ;;  %s271_s19 = scalar_select %p270_p10, %s732_s28, 1  ;;  %vm283_vm0 = vcmask 261120   ;;  %vm307_vm1 = vcmask 785920  }
  0x14   : > { %299 = vmatpush.msra.mxu0 %v278_v0  ;;  %v275_v3 = vld [vmem:[%s860_s1] sm:$0xff]  ;;  %v360_v45 = vld [vmem:[%s862_s3 + $0x18] sm:$0xff]  ;;  %v359_v46 = vld [vmem:[%s862_s3 + $0x10] sm:$0xff] }
  0x15   : > { %s545_s22 = sshll.u32 %s271_s19, 3  ;;  %v594_v5 = vld [vmem:[%s861_s2] ss:$0 sm:$0xff]  ;;  %382 = vmatpush.msra.mxu1 %v360_v45  ;;  %v358_v47 = vld [vmem:[%s862_s3 + $0x8] sm:$0xff] }
  0x16   : > { %300 = vmatpush.msra.mxu0 %v277_v1  ;;  %s273_s8 = scalar_lea.vmem %s859_s0, %s545_s22  ;;  %v357_v48 = vld [vmem:[%s862_s3] sm:$0xff]  ;;  %s550_s22 = sshll.u32 %s732_s28, 3 }
  0x17   : > { %v274_v4 = vld [vmem:[%s273_s8] sm:$0xff]  ;;  %383 = vmatpush.msra.mxu1 %v359_v46  ;;  %s476_s13 = scalar_lea.hbm %s866_s7, %s550_s22  ;;  %s466_s28 = scalar_lea.sflag [#allocation3], %s267_s20 }
  0x18   : > { %301 = vmatpush.msra.mxu0 %v276_v2  ;;  %v595_v52 = vld [vmem:[%s863_s4] ss:$0 sm:$0xff]  ;;  %v435_v2 = vld [vmem:[%s864_s5 + $0x18] sm:$0xff]  ;;  %s480_s16 = sshll.u32 %s476_s13, 4  ;;  %s481_s16 = int_to_ptr.hbm [resolvable:$true] %s480_s16 }
  0x19   : > { %384 = vmatpush.msra.mxu1 %v358_v47  ;;  %455 = vmatpush.msra.mxu2 %v435_v2  ;;  %s619_s17 = sshra.s32 %s481_s16, 4  ;;  %s620_s17 = int_to_ptr.hbm [resolvable:$true] %s619_s17 }
  0x1a   : > { %302 = vmatpush.msra.mxu0 %v275_v3  ;;  %v434_v3 = vld [vmem:[%s864_s5 + $0x10] sm:$0xff]  ;;  %s621_s18 = scalar_lea.hbm %s620_s17, 8  ;;  %p626_p0 = scmp.lt.s32.totalorder %s620_s17, %s866_s7 }
  0x1b   : > { %546 = vmatmul.msk.f32.vlgmr.msra.gmra.mxu0 %vm283_vm0, %v274_v4  ;;  %385 = vmatpush.msra.mxu1 %v357_v48  ;;  %p622_p11 = scmp.ne.s32.totalorder %s620_s17, %s621_s18 }
  0x1c   : > { %456 = vmatpush.msra.mxu2 %v434_v3 }
  0x1d   : > { %p623_p12 = pnand %p622_p11, %p749_p5 }
  0x1f   : > { %p624_p13 = pneg %p623_p12 }
  0x98   : > { %v304_v6 = vpop.f32.mrf.mxu0 }
  0x99   : > { %v780_v7 = vadd.f32 %v594_v5, %v304_v6  ;;  %v433_v5 = vld [vmem:[%s864_s5 + $0x8] sm:$0xff] }
  0x9a   : > { %457 = vmatpush.msra.mxu2 %v433_v5 }
  0x9b   : > { %341 = vrot.lane.b32.xlu0 %v780_v7, %s669_s14  ;;  %v308_v8 = vsel %vm307_vm1, %v780_v7, -inf  ;;  %s269_s14 = scalar_lea.vmem [#allocation2], %s544_s21  ;;  %s625_s21 = scalar_lea.hbm %s866_s7, 16 }
  0x9c   : > { %v309_v9 = vrot.slane %v308_v8, 4  ;;  %p627_p1 = scmp.lt.s32.totalorder %s625_s21, %s621_s18 }
  0x9e   : > { %v310_v10 = vmax.f32 %v308_v8, %v309_v9  ;;  %v432_v8 = vld [vmem:[%s864_s5] sm:$0xff]  ;;  %p628_p2 = por %p627_p1, %p626_p0 }
  0x9f   : > { %458 = vmatpush.msra.mxu2 %v432_v8 }
  0xa0   : > { %v311_v11 = vrot.slane %v310_v10, 2  ;;  %p629_p3 = pnand %p628_p2, %p624_p13 }
  0xa2   : > { %v312_v12 = vmax.f32 %v310_v10, %v311_v11 }
  0xa4   : > { %v313_v13 = vrot.slane %v312_v12, 1 }
  0xa6   : > { %v314_v14 = vmax.f32 %v312_v12, %v313_v13 }
  0xa8   : > { %v315_v15 = vsub.f32 %v780_v7, %v314_v14 }
  0xaa   : > { %v316_v16 = vmul.f32 1.442695, %v315_v15 }
  0xac   : > { %597 = vpow2.f32 %v316_v16 }
  0xb2   : > { %v598_v17 = vpop.eup %597 }
  0xb3   : > { %v318_v18 = vsel %vm307_vm1, %v598_v17, 0.0 }
  0xb4   : > { %v319_v19 = vrot.slane %v318_v18, 4 }
  0xb6   : > { %v320_v20 = vadd.f32 %v319_v19, %v318_v18 }
  0xb8   : > { %v321_v21 = vrot.slane %v320_v20, 2 }
  0xba   : > { %v322_v22 = vadd.f32 %v321_v21, %v320_v20 }
  0xbc   : > { %v323_v23 = vrot.slane %v322_v22, 1 }
  0xbe   : > { %v324_v24 = vadd.f32 %v323_v23, %v322_v22 }
  0xc0   : > { %599 = vrcp.f32 %v324_v24  ;;  %v336_v30 = vand.u32 2147483648, %v324_v24  ;;  %vm330_vm3 = vweird.f32 %v324_v24  ;;  %v334_v31 = vand.u32 2147483647, %v324_v24 }
  0xc2   : > { %v337_v33 = vor.u32 1.1754944e-38, %v336_v30  ;;  %vm335_vm5 = vcmp.eq.f32.partialorder %v334_v31, 8.507059e+37 }
  0xc6   : > { %v600_v25 = vpop.eup %599 }
  0xc7   : > { %v326_v26 = vmul.f32 %v600_v25, %v324_v24  ;;  %vm331_vm2 = vweird.f32 %v600_v25 }
  0xc8   : > { %vm332_vm4 = vmor %vm330_vm3, %vm331_vm2 }
  0xc9   : > { %v327_v27 = vsub.f32 1.0, %v326_v26 }
  0xcb   : > { %v328_v28 = vmul.f32 %v600_v25, %v327_v27 }
  0xcd   : > { %v329_v29 = vadd.f32 %v600_v25, %v328_v28 }
  0xcf   : > { %v333_v32 = vsel %vm332_vm4, %v600_v25, %v329_v29 }
  0xd0   : > { %v338_v34 = vsel %vm335_vm5, %v337_v33, %v333_v32  ;;  %v596_v33 = vld [vmem:[%s865_s6] ss:$0 sm:$0xff] }
  0xd1   : > { %v339_v35 = vmul.f32 %v598_v17, %v338_v34 }
 0x10d   : > { %v342_v36 = vpop.permute.xlu0 %341 }
 0x10e   : > { %v344_v37 = vmul.f32 %v342_v36, %v339_v35 }
 0x110   : > { %v345_v38 = vsel %vm307_vm1, %v344_v37, 0.0 }
 0x111   : > { %v346_v39 = vrot.slane %v345_v38, 4 }
 0x113   : > { %v347_v40 = vadd.f32 %v346_v39, %v345_v38 }
 0x115   : > { %v348_v41 = vrot.slane %v347_v40, 2 }
 0x117   : > { %v349_v42 = vadd.f32 %v348_v41, %v347_v40 }
 0x119   : > { %v350_v43 = vrot.slane %v349_v42, 1 }
 0x11b   : > { %v351_v44 = vadd.f32 %v350_v43, %v349_v42 }
 0x11d   : > { %353 = vrot.lane.b32.xlu0 %v351_v44, %s670_s15 }
 0x18f   : > { %v354_v49 = vpop.permute.xlu0 %353 }
 0x190   : > { %v356_v50 = vmul.f32 %v354_v49, %v780_v7 }
 0x192   : > { %366 = vrot.lane.b32.xlu1 %v356_v50, %s670_s15  ;;  %s478_s15 = sshll.u32 %s269_s14, 4  ;;  %s479_s15 = int_to_ptr.vmem [resolvable:$true] %s478_s15 }
 0x204   : > { %v367_v51 = vpop.permute.xlu1 %366 }
 0x205   : > { %547 = vmatmul.msk.f32.vlgmr.msra.gmra.mxu1 %vm283_vm0, %v367_v51 }
 0x282   : > { %v387_v53 = vpop.f32.mrf.mxu1 }
 0x283   : > { %v388_v54 = vadd.f32 %v595_v52, %v387_v53 }
 0x285   : > { %v390_v55 = vsel %vm283_vm0, %v388_v54, -inf }
 0x286   : > { %v391_v56 = vrot.slane %v390_v55, 4 }
 0x288   : > { %v392_v57 = vmax.f32 %v390_v55, %v391_v56 }
 0x28a   : > { %v393_v58 = vrot.slane %v392_v57, 2 }
 0x28c   : > { %v394_v59 = vmax.f32 %v392_v57, %v393_v58 }
 0x28e   : > { %v395_v60 = vrot.slane %v394_v59, 1 }
 0x290   : > { %v396_v61 = vmax.f32 %v394_v59, %v395_v60 }
 0x292   : > { %v397_v62 = vsub.f32 %v388_v54, %v396_v61 }
 0x294   : > { %v398_v63 = vmul.f32 1.442695, %v397_v62 }
 0x296   : > { %601 = vpow2.f32 %v398_v63 }
 0x29c   : > { %v602_v0 = vpop.eup %601 }
 0x29d   : > { %v400_v1 = vsel %vm283_vm0, %v602_v0, 0.0 }
 0x29e   : > { %v401_v4 = vrot.slane %v400_v1, 4 }
 0x2a0   : > { %v402_v6 = vadd.f32 %v401_v4, %v400_v1 }
 0x2a2   : > { %v403_v9 = vrot.slane %v402_v6, 2 }
 0x2a4   : > { %v404_v10 = vadd.f32 %v403_v9, %v402_v6 }
 0x2a6   : > { %v405_v11 = vrot.slane %v404_v10, 1 }
 0x2a8   : > { %v406_v12 = vadd.f32 %v405_v11, %v404_v10 }
 0x2aa   : > { %603 = vrcp.f32 %v406_v12  ;;  %v418_v16 = vand.u32 2147483648, %v406_v12  ;;  %v416_v18 = vand.u32 2147483647, %v406_v12  ;;  %vm412_vm7 = vweird.f32 %v406_v12 }
 0x2ac   : > { %v419_v20 = vor.u32 1.1754944e-38, %v418_v16  ;;  %vm417_vm9 = vcmp.eq.f32.partialorder %v416_v18, 8.507059e+37 }
 0x2b0   : > { %v604_v13 = vpop.eup %603 }
 0x2b1   : > { %v408_v14 = vmul.f32 %v604_v13, %v406_v12  ;;  %vm413_vm6 = vweird.f32 %v604_v13 }
 0x2b2   : > { %vm414_vm8 = vmor %vm412_vm7, %vm413_vm6 }
 0x2b3   : > { %v409_v15 = vsub.f32 1.0, %v408_v14 }
 0x2b5   : > { %v410_v17 = vmul.f32 %v604_v13, %v409_v15 }
 0x2b7   : > { %v411_v19 = vadd.f32 %v604_v13, %v410_v17 }
 0x2b9   : > { %v415_v21 = vsel %vm414_vm8, %v604_v13, %v411_v19 }
 0x2ba   : > { %v420_v22 = vsel %vm417_vm9, %v419_v20, %v415_v21 }
 0x2bb   : > { %v421_v23 = vmul.f32 %v602_v0, %v420_v22 }
 0x2bd   : > { %v423_v24 = vmul.f32 %v421_v23, %v367_v51 }
 0x2bf   : > { %v424_v25 = vsel %vm283_vm0, %v423_v24, 0.0 }
 0x2c0   : > { %v425_v26 = vrot.slane %v424_v25, 4 }
 0x2c2   : > { %v426_v27 = vadd.f32 %v425_v26, %v424_v25 }
 0x2c4   : > { %v427_v28 = vrot.slane %v426_v27, 2 }
 0x2c6   : > { %v428_v29 = vadd.f32 %v427_v28, %v426_v27 }
 0x2c8   : > { %v429_v30 = vrot.slane %v428_v29, 1 }
 0x2ca   : > { %v430_v31 = vadd.f32 %v429_v30, %v428_v29 }
 0x2cc   : > { %v431_v32 = vmul.f32 %v430_v31, %v780_v7 }
 0x2ce   : > { %548 = vmatmul.msk.f32.vlgmr.msra.gmra.mxu2 %vm283_vm0, %v431_v32 }
 0x351   : > { %v460_v34 = vpop.f32.mrf.mxu2 }
 0x352   : > { %v461_v35 = vadd.f32 %v596_v33, %v460_v34 }
 0x354   : > { %v463_v36 = vadd.f32 %v461_v35, %v780_v7 }
 0x356   : > { %464 = vst.msk [vmem:[%s269_s14] sm:$0xff] %vm283_vm0, %v463_v36 }
 0x357   : > { %632 = shalt.err (!%p629_p3)
}
 0x358   : > { %553 = dma.vmem_to_hbm [thread:$0]  (%p749_p5), %s479_s15, 128, %s481_s16, %s466_s28  }
 0x359 PF: > { %p559_p4 = scmp.ge.s32.totalorder %s667_s27, 2  ;;  %s492_s20 = sand.u32 1, %s655_s24  }
 0x35a   : > { %s493_s8 = scalar_lea.sflag [#allocation3], %s492_s20 }
 0x35b   : > { %p556_p7 = pnand %p559_p4, %p753_p6 }
 0x35d   : > { %p557_p8 = pneg %p556_p7 }
 0x35f   : > { %650 = dma.done.wait (%p557_p8), %s493_s8, 128  }
 0x360   : > { %652 = vsyncadd (%p557_p8), %s493_s8, 4294967168  ;;  %p17_p9 = scmp.ge.s32.totalorder %s736_s30, 4   ;;  %s869_s24 = smov %s659_s25 }
 0x361   : > { %s870_s25 = smov %s663_s26  ;;  %s871_s26 = smov %s747_s10 }
 0x362   : > { %s872_s27 = smov %s736_s30  ;;  %19 = sbr.rel (!%p17_p9) target bundleno = 3 (0x3), region = 83 }
 0x367   :  { %499 = vsyncpa [#allocation3], 1 }
 0x368   :  { %501 = vsyncpa [#allocation3 + $0x1], 1 }

</bundles_post_ra>
